<compile_context>
chip_gen: v7x
topology: tpu7x:2x2x1
jax: 0.10.0
libtpu: 0.0.40
codegen_flags: <defaults>
</compile_context>

<pallas_src>
import jax
import jax.numpy as jnp
from jax import lax
from jax.experimental import pallas as pl
from jax.experimental.pallas import tpu as pltpu

_BN_EPS = 1e-5
_LANE = 128
_SUBLANE = 8
_MAX_ROW_TILE = 1024                   # amortizes per-step overhead on v6e
_MAX_W_TILE_BYTES = 8 * 1024 * 1024    # per column-tile weight budget (v7x-safe)


def _round_up(v, m):
    return ((v + m - 1) // m) * m


def _vmem_limit_bytes():
    """~3/4 of physical VMEM, clamped to [32 MiB, 96 MiB] (v5e/v6e: 128 MiB, v7x: 64 MiB)."""
    cap = 128 * 1024 * 1024
    try:
        cap = int(pltpu.get_tpu_info().vmem_capacity_bytes)
    except Exception:
        pass
    return int(min(96 * 1024 * 1024, max(32 * 1024 * 1024, cap * 3 // 4)))


def _col_tiling(in_dim, out_dim, itemsize):
    """Lane-dense output padding + column tile width.

    Prefers 256-wide granules (full 2x256x256 MXU on v6e/v7x) for big layers,
    128 otherwise, and keeps one (in_dim, tile_c) weight tile <= ~8 MiB.
    """
    granule = 256 if out_dim >= 256 else _LANE
    out_pad = _round_up(out_dim, granule)
    cap = max(granule,
              (_MAX_W_TILE_BYTES // max(1, in_dim * itemsize)) // granule * granule)
    tile_c = min(out_pad, cap)
    out_pad = _round_up(out_pad, tile_c)
    return out_pad, tile_c


def _choose_row_tile(n, bytes_per_row, resident_bytes, vmem_limit):
    """Row tile from the VMEM budget left after the resident weight tile."""
    budget = max(vmem_limit - 2 * resident_bytes, vmem_limit // 4)
    t = budget // max(1, 2 * bytes_per_row)           # double-buffered h + z
    t = max(_SUBLANE, min(_MAX_ROW_TILE, (t // _SUBLANE) * _SUBLANE))
    return min(t, _round_up(n, _SUBLANE))


# --------------------------------------------------------------------------
# Row/column tiled single-layer stage (large-batch path)
# --------------------------------------------------------------------------
def _make_stage_kernel(apply_bn_relu, emit_stats, add_bias, mask_rows,
                       n_true, tile_n, mm_dtype):
    def kernel(*refs):
        it = iter(refs)
        h_ref = next(it)
        st_ref = next(it) if apply_bn_relu else None
        w_ref = next(it)
        b_ref = next(it) if add_bias else None
        z_ref = next(it)
        stats_ref = next(it) if emit_stats else None

        h = h_ref[...].astype(jnp.float32)
        if apply_bn_relu:
            s = st_ref[0:1, :]                           # [1, K] scale
            t = st_ref[1:2, :]                           # [1, K] shift
            h = jnp.maximum(h * s + t, 0.0)              # fused BN affine + ReLU
            if mask_rows:
                # Padded rows become nonzero after the shift; zero them so the
                # next layer's batch statistics stay unbiased.  (tile_n, 1)
                # iota only -- cheap select, no full-tile iota.
                rows = (pl.program_id(0) * tile_n
                        + lax.broadcasted_iota(jnp.int32, (h.shape[0], 1), 0))
                h = jnp.where(rows < n_true, h, 0.0)

        z = jnp.dot(h.astype(mm_dtype), w_ref[...],
                    preferred_element_type=jnp.float32)
        if add_bias:
            z = z + b_ref[...]
        z_ref[...] = z.astype(z_ref.dtype)

        if emit_stats:
            # Two direct sub-stores (no concat / relayout).
            stats_ref[0:1, :] = jnp.sum(z, axis=0, keepdims=True)
            stats_ref[1:2, :] = jnp.sum(z * z, axis=0, keepdims=True)

    return kernel


def _stage(h_pad, w, st, bias, *, apply_bn_relu, emit_stats, tile_n, tile_c,
           n_true, act_dtype, mm_dtype, vmem_limit):
    """One row/column tiled Linear layer as a pallas_call."""
    n_pad, in_dim = h_pad.shape
    out_dim = w.shape[1]
    nt_r = n_pad // tile_n
    nt_c = out_dim // tile_c
    mask_rows = apply_bn_relu and emit_stats and (n_pad != n_true)

    kernel = _make_stage_kernel(apply_bn_relu, emit_stats, bias is not None,
                                mask_rows, n_true, tile_n, mm_dtype)

    inputs = [h_pad]
    in_specs = [pl.BlockSpec((tile_n, in_dim), lambda i, j: (i, 0))]
    if apply_bn_relu:
        inputs.append(st)
        in_specs.append(pl.BlockSpec((2, in_dim), lambda i, j: (0, 0)))
    inputs.append(w)
    in_specs.append(pl.BlockSpec((in_dim, tile_c), lambda i, j: (0, j)))
    if bias is not None:
        inputs.append(bias)
        in_specs.append(pl.BlockSpec((1, tile_c), lambda i, j: (0, j)))

    z_dtype = act_dtype if emit_stats else jnp.float32
    out_shape = [jax.ShapeDtypeStruct((n_pad, out_dim), z_dtype)]
    out_specs = [pl.BlockSpec((tile_n, tile_c), lambda i, j: (i, j))]
    if emit_stats:
        out_shape.append(jax.ShapeDtypeStruct((nt_r, 2, out_dim), jnp.float32))
        out_specs.append(pl.BlockSpec((None, 2, tile_c), lambda i, j: (i, 0, j)))

    result = pl.pallas_call(
        kernel,
        out_shape=tuple(out_shape),
        grid=(nt_r, nt_c),
        in_specs=in_specs,
        out_specs=tuple(out_specs),
        compiler_params=pltpu.CompilerParams(
            dimension_semantics=("parallel", "parallel"),
            vmem_limit_bytes=vmem_limit),
    )(*inputs)

    if emit_stats:
        return result[0], result[1]
    return result[0], None


# --------------------------------------------------------------------------
# Fully fused kernel (small-batch path: whole batch resident in VMEM)
# --------------------------------------------------------------------------
def _make_fused_kernel(num_hidden, n_true, n_pad, mm_dtype):
    inv_n = 1.0 / float(n_true)
    mask_rows = (n_pad != n_true)

    def kernel(*refs):
        it = iter(refs)
        x_ref = next(it)
        hidden = [(next(it), next(it)) for _ in range(num_hidden)]
        w_last = next(it)
        b_last = next(it)
        o_ref = next(it)

        h = x_ref[...].astype(jnp.float32)
        if mask_rows:
            row_ok = lax.broadcasted_iota(jnp.int32, (n_pad, 1), 0) < n_true
        for w_ref, gb_ref in hidden:
            z = jnp.dot(h.astype(mm_dtype), w_ref[...],
                        preferred_element_type=jnp.float32)
            # Padded rows contribute exact zeros (x pad rows are zero, hidden
            # layers carry no bias, and h is re-zeroed after each epilogue).
            mean = jnp.sum(z, axis=0, keepdims=True) * inv_n
            var = jnp.maximum(
                jnp.sum(z * z, axis=0, keepdims=True) * inv_n - mean * mean, 0.0)
            s = gb_ref[0:1, :] * lax.rsqrt(var + _BN_EPS)
            t = gb_ref[1:2, :] - mean * s
            h = jnp.maximum(z * s + t, 0.0)
            if mask_rows:
                h = jnp.where(row_ok, h, 0.0)
        z = jnp.dot(h.astype(mm_dtype), w_last[...],
                    preferred_element_type=jnp.float32)
        o_ref[...] = z + b_last[...]

    return kernel


def _fused_forward(x_pad, hidden_params, w_last, b_last, n_true, mm_dtype,
                   vmem_limit):
    n_pad, in_dim = x_pad.shape
    out_pad = w_last.shape[1]
    num_hidden = len(hidden_params)

    inputs = [x_pad]
    in_specs = [pl.BlockSpec((n_pad, in_dim), lambda i: (0, 0))]
    for w, gb in hidden_params:
        inputs += [w, gb]
        in_specs += [pl.BlockSpec(w.shape, lambda i: (0, 0)),
                     pl.BlockSpec(gb.shape, lambda i: (0, 0))]
    inputs += [w_last, b_last]
    in_specs += [pl.BlockSpec(w_last.shape, lambda i: (0, 0)),
                 pl.BlockSpec(b_last.shape, lambda i: (0, 0))]

    kernel = _make_fused_kernel(num_hidden, n_true, n_pad, mm_dtype)
    return pl.pallas_call(
        kernel,
        out_shape=jax.ShapeDtypeStruct((n_pad, out_pad), jnp.float32),
        grid=(1,),
        in_specs=in_specs,
        out_specs=pl.BlockSpec((n_pad, out_pad), lambda i: (0, 0)),
        compiler_params=pltpu.CompilerParams(
            dimension_semantics=("arbitrary",),
            vmem_limit_bytes=vmem_limit),
    )(*inputs)


# --------------------------------------------------------------------------
# Public forward
# --------------------------------------------------------------------------
def mlp_forward(x, linears, batch_norms, *,
                matmul_dtype=jnp.bfloat16, act_dtype=jnp.bfloat16,
                row_tile=None):
    """Fused MLP forward matching the PyTorch module (training-mode BatchNorm).

    Args:
      x: [N, input_dim] float32.
      linears: list of (W [out, in], b [out]) PyTorch-shaped params.
      batch_norms: list of (gamma [hidden], beta [hidden]) for layers 0..L-2.
      matmul_dtype / act_dtype: MXU / inter-stage activation dtypes (bf16 default).
      row_tile: optional row-tile override (forces the multi-call tiled path).
    """
    num_layers = len(linears)
    n, input_dim = x.shape
    output_dim = linears[-1][0].shape[0]
    mm_itemsize = jnp.dtype(matmul_dtype).itemsize
    vmem_limit = _vmem_limit_bytes()

    # ---- parameter prep: lane-dense padded dims, pre-cast weights, drop hidden
    # biases (exactly cancelled by training-mode BatchNorm). ----
    hidden_params = []     # (W [in_pad, out_pad] mm_dtype, gamma/beta [2, out_pad] f32)
    col_tiles = []
    prev_pad = input_dim
    for i in range(num_layers - 1):
        W, _bias_dropped = linears[i]
        gamma, beta = batch_norms[i]
        h_out = W.shape[0]
        out_pad, tile_c = _col_tiling(prev_pad, h_out, mm_itemsize)
        Wt = jnp.asarray(W, jnp.float32).T                              # [in, out]
        Wt = jnp.pad(Wt, ((0, prev_pad - Wt.shape[0]), (0, out_pad - h_out)))
        g = jnp.pad(jnp.asarray(gamma, jnp.float32), (0, out_pad - h_out))
        b = jnp.pad(jnp.asarray(beta, jnp.float32), (0, out_pad - h_out))
        hidden_params.append((Wt.astype(matmul_dtype), jnp.stack([g, b], axis=0)))
        col_tiles.append(tile_c)
        prev_pad = out_pad

    W_last, b_last = linears[-1]
    out_pad, tile_c_last = _col_tiling(prev_pad, output_dim, mm_itemsize)
    Wl = jnp.asarray(W_last, jnp.float32).T
    Wl = jnp.pad(Wl, ((0, prev_pad - Wl.shape[0]), (0, out_pad - output_dim)))
    Wl = Wl.astype(matmul_dtype)
    bl = jnp.pad(jnp.asarray(b_last, jnp.float32), (0, out_pad - output_dim))[None, :]

    x32 = jnp.asarray(x, jnp.float32)
    n_pad8 = _round_up(n, _SUBLANE)

    # ---- tiling decisions ----
    widest = max([input_dim, out_pad] + [wp.shape[1] for wp, _ in hidden_params])
    w_tile_bytes = [Wl.shape[0] * tile_c_last * mm_itemsize]
    for (wp, _), tc in zip(hidden_params, col_tiles):
        w_tile_bytes.append(wp.shape[0] * tc * mm_itemsize)
    resident = max(w_tile_bytes)

    if row_tile is not None:
        tile_n = max(_SUBLANE, _round_up(row_tile, _SUBLANE))
    else:
        tile_n = _choose_row_tile(n, 2 * 4 * widest, resident, vmem_limit)

    total_param_bytes = int(Wl.size) * mm_itemsize + int(bl.size) * 4
    for wp, gb in hidden_params:
        total_param_bytes += int(wp.size) * mm_itemsize + int(gb.size) * 4
    all_widths = [input_dim] + [wp.shape[1] for wp, _ in hidden_params] + [out_pad]
    act_bytes = n_pad8 * sum(all_widths) * 4
    use_fused = (row_tile is None and n_pad8 <= tile_n
                 and total_param_bytes + act_bytes <= vmem_limit // 2)

    # ---- small-batch path: everything in one kernel ----
    if use_fused:
        x_pad = x32 if n_pad8 == n else jnp.pad(x32, ((0, n_pad8 - n), (0, 0)))
        out = _fused_forward(x_pad, hidden_params, Wl, bl, n, matmul_dtype,
                             vmem_limit)
        return out[:n, :output_dim]

    # ---- large-batch path: one row/column tiled pallas_call per layer ----
    n_pad = _round_up(n, tile_n)
    h = x32
    if n_pad != n:
        h = jnp.pad(h, ((0, n_pad - n), (0, 0)))
    st = None
    for i in range(num_layers - 1):
        wp, gb = hidden_params[i]
        z, partial = _stage(
            h, wp, st, None,
            apply_bn_relu=(i > 0), emit_stats=True,
            tile_n=tile_n, tile_c=col_tiles[i], n_true=n,
            act_dtype=act_dtype, mm_dtype=matmul_dtype, vmem_limit=vmem_limit)
        stats = jnp.sum(partial, axis=0)                 # [2, out_pad]
        mean = stats[0] / n
        var = jnp.maximum(stats[1] / n - mean * mean, 0.0)
        s = gb[0] * lax.rsqrt(var + _BN_EPS)
        t = gb[1] - mean * s
        st = jnp.stack([s, t], axis=0)                   # [2, out_pad] for next stage
        h = z

    out, _ = _stage(
        h, Wl, st, bl,
        apply_bn_relu=(num_layers > 1), emit_stats=False,
        tile_n=tile_n, tile_c=tile_c_last, n_true=n,
        act_dtype=act_dtype, mm_dtype=matmul_dtype, vmem_limit=vmem_limit)
    return out[:n, :output_dim]


# --------------------------------------------------------------------------
# Pure-JAX reference (matches the PyTorch forward, training-mode BN) & params
# --------------------------------------------------------------------------
def mlp_reference(x, linears, batch_norms):
    num_layers = len(linears)
    h = x.astype(jnp.float32)
    for i in range(num_layers - 1):
        W, b = linears[i]
        g, be = batch_norms[i]
        z = h @ W.T + b
        mean = jnp.mean(z, axis=0, keepdims=True)
        var = jnp.mean(jnp.square(z - mean), axis=0, keepdims=True)
        zn = (z - mean) * lax.rsqrt(var + _BN_EPS)
        h = jnp.maximum(zn * g + be, 0.0)
    W_last, b_last = linears[-1]
    return h @ W_last.T + b_last


def init_mlp_params(key, num_layers, input_dim, hidden_dim, output_dim):
    linears, batch_norms = [], []
    dims = ([input_dim] + [hidden_dim] * (num_layers - 1) + [output_dim]
            if num_layers > 1 else [input_dim, output_dim])
    for i in range(num_layers):
        fan_in, fan_out = dims[i], dims[i + 1]
        key, kw, kb = jax.random.split(key, 3)
        bound = 1.0 / jnp.sqrt(fan_in)
        W = jax.random.uniform(kw, (fan_out, fan_in), jnp.float32, -bound, bound)
        b = jax.random.uniform(kb, (fan_out,), jnp.float32, -bound, bound)
        linears.append((W, b))
    for _ in range(num_layers - 1):
        key, kg, kbe = jax.random.split(key, 3)
        gamma = 1.0 + 0.1 * jax.random.normal(kg, (hidden_dim,), jnp.float32)
        beta = 0.1 * jax.random.normal(kbe, (hidden_dim,), jnp.float32)
        batch_norms.append((gamma, beta))
    return linears, batch_norms


if __name__ == "__main__":
    num_layers = 3
    input_dim = 16
    hidden_dim = 32
    output_dim = 8

    key = jax.random.PRNGKey(0)
    key, kp = jax.random.split(key)
    linears, batch_norms = init_mlp_params(
        kp, num_layers, input_dim, hidden_dim, output_dim)

    # (batch=8, None)  -> fused single-kernel path, tile-aligned rows
    # (batch=10, None) -> fused path with padded rows (masked batch stats)
    # (batch=10, 8)    -> forced multi-tile per-layer path with row padding
    for batch, row_tile in ((8, None), (10, None), (10, 8)):
        key, kx = jax.random.split(key)
        x = jax.random.normal(kx, (batch, input_dim), jnp.float32)
        ref = mlp_reference(x, linears, batch_norms)

        # Exact-precision path (f32 matmul / f32 activations): bit-faithful check.
        out_f32 = jax.block_until_ready(
            mlp_forward(x, linears, batch_norms,
                        matmul_dtype=jnp.float32, act_dtype=jnp.float32,
                        row_tile=row_tile))
        assert out_f32.shape == (batch, output_dim)
        err = float(jnp.max(jnp.abs(out_f32 - ref)))
        assert jnp.allclose(out_f32, ref, atol=1e-4, rtol=1e-4), \
            f"f32 path max abs err={err} (batch={batch}, row_tile={row_tile})"

        # Production path (bf16 weights + activations, f32 accumulate): sanity
        # check against the f32 reference with a bf16-appropriate tolerance.
        out_bf16 = jax.block_until_ready(
            mlp_forward(x, linears, batch_norms, row_tile=row_tile))
        err_bf = float(jnp.max(jnp.abs(out_bf16 - ref)))
        assert jnp.allclose(out_bf16, ref, atol=1e-1, rtol=1e-1), \
            f"bf16 path max abs err={err_bf} (batch={batch}, row_tile={row_tile})"

    # num_layers == 1 ("linear_or_not") configuration of the module.
    lin1, _ = init_mlp_params(jax.random.PRNGKey(1), 1, input_dim, hidden_dim,
                              output_dim)
    key, kx = jax.random.split(key)
    x1 = jax.random.normal(kx, (8, input_dim), jnp.float32)
    out1 = jax.block_until_ready(
        mlp_forward(x1, lin1, [], matmul_dtype=jnp.float32,
                    act_dtype=jnp.float32))
    ref1 = x1 @ lin1[0][0].T + lin1[0][1]
    assert jnp.allclose(out1, ref1, atol=1e-4, rtol=1e-4)

    print("KERNEL_OK")
</pallas_src>

<mosaic_0001>
module attributes {stable_mosaic.version = 11 : i64} {
  func.func @kernel(%arg0: i32, %arg1: memref<8x16xf32, #tpu.memory_space<vmem>>, %arg2: memref<16x128xf32, #tpu.memory_space<vmem>>, %arg3: memref<2x128xf32, #tpu.memory_space<vmem>>, %arg4: memref<128x128xf32, #tpu.memory_space<vmem>>, %arg5: memref<2x128xf32, #tpu.memory_space<vmem>>, %arg6: memref<128x128xf32, #tpu.memory_space<vmem>>, %arg7: memref<1x128xf32, #tpu.memory_space<vmem>>, %arg8: memref<8x128xf32, #tpu.memory_space<vmem>>) attributes {dimension_semantics = [#tpu.dimension_semantics<arbitrary>], iteration_bounds = array<i64: 1>, scalar_prefetch = 0 : i64, scratch_operands = 0 : i64, tpu.core_type = #tpu.core_type<tc>, window_params = [{pipeline_mode = #tpu.pipeline_mode<synchronous>, transform_indices = @transform_0, window_bounds = array<i64: 8, 16>}, {pipeline_mode = #tpu.pipeline_mode<synchronous>, transform_indices = @transform_1, window_bounds = array<i64: 16, 128>}, {pipeline_mode = #tpu.pipeline_mode<synchronous>, transform_indices = @transform_2, window_bounds = array<i64: 2, 128>}, {pipeline_mode = #tpu.pipeline_mode<synchronous>, transform_indices = @transform_3, window_bounds = array<i64: 128, 128>}, {pipeline_mode = #tpu.pipeline_mode<synchronous>, transform_indices = @transform_4, window_bounds = array<i64: 2, 128>}, {pipeline_mode = #tpu.pipeline_mode<synchronous>, transform_indices = @transform_5, window_bounds = array<i64: 128, 128>}, {pipeline_mode = #tpu.pipeline_mode<synchronous>, transform_indices = @transform_6, window_bounds = array<i64: 1, 128>}, {pipeline_mode = #tpu.pipeline_mode<synchronous>, transform_indices = @transform_7, window_bounds = array<i64: 8, 128>}]} {
    %c0 = arith.constant 0 : index
    %c0_0 = arith.constant 0 : index
    %0 = vector.load %arg1[%c0, %c0_0] : memref<8x16xf32, #tpu.memory_space<vmem>>, vector<8x16xf32>
    %c0_1 = arith.constant 0 : index
    %c0_2 = arith.constant 0 : index
    %1 = vector.load %arg2[%c0_1, %c0_2] : memref<16x128xf32, #tpu.memory_space<vmem>>, vector<16x128xf32>
    %cst = arith.constant dense<0.000000e+00> : vector<8x128xf32>
    %2 = tpu.matmul %0, %1, %cst {dimension_numbers = #tpu.dot_dimension_numbers<[1], [0], [0], [1], [0, 0, 1, 1], [], []>} : vector<8x16xf32>, vector<16x128xf32>, vector<8x128xf32> -> vector<8x128xf32>
    %cst_3 = arith.constant dense<0.000000e+00> : vector<128xf32>
    %3 = vector.multi_reduction <add>, %2, %cst_3 [0] : vector<8x128xf32> to vector<128xf32>
    %4 = vector.shape_cast %3 : vector<128xf32> to vector<1x128xf32>
    %cst_4 = arith.constant 1.250000e-01 : f32
    %5 = vector.broadcast %cst_4 : f32 to vector<1x128xf32>
    %6 = arith.mulf %4, %5 : vector<1x128xf32>
    %7 = arith.mulf %2, %2 : vector<8x128xf32>
    %cst_5 = arith.constant dense<0.000000e+00> : vector<128xf32>
    %8 = vector.multi_reduction <add>, %7, %cst_5 [0] : vector<8x128xf32> to vector<128xf32>
    %9 = vector.shape_cast %8 : vector<128xf32> to vector<1x128xf32>
    %cst_6 = arith.constant 1.250000e-01 : f32
    %10 = vector.broadcast %cst_6 : f32 to vector<1x128xf32>
    %11 = arith.mulf %9, %10 : vector<1x128xf32>
    %12 = arith.mulf %6, %6 : vector<1x128xf32>
    %13 = arith.subf %11, %12 : vector<1x128xf32>
    %cst_7 = arith.constant 0.000000e+00 : f32
    %14 = vector.broadcast %cst_7 : f32 to vector<1x128xf32>
    %15 = arith.maximumf %13, %14 : vector<1x128xf32>
    %c0_8 = arith.constant 0 : index
    %c0_9 = arith.constant 0 : index
    %16 = vector.load %arg3[%c0_8, %c0_9] : memref<2x128xf32, #tpu.memory_space<vmem>>, vector<1x128xf32>
    %cst_10 = arith.constant 9.99999974E-6 : f32
    %17 = vector.broadcast %cst_10 : f32 to vector<1x128xf32>
    %18 = arith.addf %15, %17 : vector<1x128xf32>
    %19 = math.rsqrt %18 : vector<1x128xf32>
    %20 = arith.mulf %16, %19 : vector<1x128xf32>
    %c1 = arith.constant 1 : index
    %c0_11 = arith.constant 0 : index
    %21 = vector.load %arg3[%c1, %c0_11] : memref<2x128xf32, #tpu.memory_space<vmem>>, vector<1x128xf32>
    %22 = arith.mulf %6, %20 : vector<1x128xf32>
    %23 = arith.subf %21, %22 : vector<1x128xf32>
    %24 = vector.broadcast %20 : vector<1x128xf32> to vector<8x128xf32>
    %25 = arith.mulf %2, %24 : vector<8x128xf32>
    %26 = vector.broadcast %23 : vector<1x128xf32> to vector<8x128xf32>
    %27 = arith.addf %25, %26 : vector<8x128xf32>
    %cst_12 = arith.constant 0.000000e+00 : f32
    %28 = vector.broadcast %cst_12 : f32 to vector<8x128xf32>
    %29 = arith.maximumf %27, %28 : vector<8x128xf32>
    %c0_13 = arith.constant 0 : index
    %c0_14 = arith.constant 0 : index
    %30 = vector.load %arg4[%c0_13, %c0_14] : memref<128x128xf32, #tpu.memory_space<vmem>>, vector<128x128xf32>
    %cst_15 = arith.constant dense<0.000000e+00> : vector<8x128xf32>
    %31 = tpu.matmul %29, %30, %cst_15 {dimension_numbers = #tpu.dot_dimension_numbers<[1], [0], [0], [1], [0, 0, 1, 1], [], []>} : vector<8x128xf32>, vector<128x128xf32>, vector<8x128xf32> -> vector<8x128xf32>
    %cst_16 = arith.constant dense<0.000000e+00> : vector<128xf32>
    %32 = vector.multi_reduction <add>, %31, %cst_16 [0] : vector<8x128xf32> to vector<128xf32>
    %33 = vector.shape_cast %32 : vector<128xf32> to vector<1x128xf32>
    %cst_17 = arith.constant 1.250000e-01 : f32
    %34 = vector.broadcast %cst_17 : f32 to vector<1x128xf32>
    %35 = arith.mulf %33, %34 : vector<1x128xf32>
    %36 = arith.mulf %31, %31 : vector<8x128xf32>
    %cst_18 = arith.constant dense<0.000000e+00> : vector<128xf32>
    %37 = vector.multi_reduction <add>, %36, %cst_18 [0] : vector<8x128xf32> to vector<128xf32>
    %38 = vector.shape_cast %37 : vector<128xf32> to vector<1x128xf32>
    %cst_19 = arith.constant 1.250000e-01 : f32
    %39 = vector.broadcast %cst_19 : f32 to vector<1x128xf32>
    %40 = arith.mulf %38, %39 : vector<1x128xf32>
    %41 = arith.mulf %35, %35 : vector<1x128xf32>
    %42 = arith.subf %40, %41 : vector<1x128xf32>
    %cst_20 = arith.constant 0.000000e+00 : f32
    %43 = vector.broadcast %cst_20 : f32 to vector<1x128xf32>
    %44 = arith.maximumf %42, %43 : vector<1x128xf32>
    %c0_21 = arith.constant 0 : index
    %c0_22 = arith.constant 0 : index
    %45 = vector.load %arg5[%c0_21, %c0_22] : memref<2x128xf32, #tpu.memory_space<vmem>>, vector<1x128xf32>
    %cst_23 = arith.constant 9.99999974E-6 : f32
    %46 = vector.broadcast %cst_23 : f32 to vector<1x128xf32>
    %47 = arith.addf %44, %46 : vector<1x128xf32>
    %48 = math.rsqrt %47 : vector<1x128xf32>
    %49 = arith.mulf %45, %48 : vector<1x128xf32>
    %c1_24 = arith.constant 1 : index
    %c0_25 = arith.constant 0 : index
    %50 = vector.load %arg5[%c1_24, %c0_25] : memref<2x128xf32, #tpu.memory_space<vmem>>, vector<1x128xf32>
    %51 = arith.mulf %35, %49 : vector<1x128xf32>
    %52 = arith.subf %50, %51 : vector<1x128xf32>
    %53 = vector.broadcast %49 : vector<1x128xf32> to vector<8x128xf32>
    %54 = arith.mulf %31, %53 : vector<8x128xf32>
    %55 = vector.broadcast %52 : vector<1x128xf32> to vector<8x128xf32>
    %56 = arith.addf %54, %55 : vector<8x128xf32>
    %cst_26 = arith.constant 0.000000e+00 : f32
    %57 = vector.broadcast %cst_26 : f32 to vector<8x128xf32>
    %58 = arith.maximumf %56, %57 : vector<8x128xf32>
    %c0_27 = arith.constant 0 : index
    %c0_28 = arith.constant 0 : index
    %59 = vector.load %arg6[%c0_27, %c0_28] : memref<128x128xf32, #tpu.memory_space<vmem>>, vector<128x128xf32>
    %cst_29 = arith.constant dense<0.000000e+00> : vector<8x128xf32>
    %60 = tpu.matmul %58, %59, %cst_29 {dimension_numbers = #tpu.dot_dimension_numbers<[1], [0], [0], [1], [0, 0, 1, 1], [], []>} : vector<8x128xf32>, vector<128x128xf32>, vector<8x128xf32> -> vector<8x128xf32>
    %c0_30 = arith.constant 0 : index
    %c0_31 = arith.constant 0 : index
    %61 = vector.load %arg7[%c0_30, %c0_31] : memref<1x128xf32, #tpu.memory_space<vmem>>, vector<1x128xf32>
    %62 = vector.broadcast %61 : vector<1x128xf32> to vector<8x128xf32>
    %63 = arith.addf %60, %62 : vector<8x128xf32>
    %c0_32 = arith.constant 0 : index
    %c0_33 = arith.constant 0 : index
    %64 = vector.load %arg8[%c0_32, %c0_33] : memref<8x128xf32, #tpu.memory_space<vmem>>, vector<8x128xf32>
    tpu.vector_store %arg8[%c0_32, %c0_33], %63 {strides = array<i32>} : memref<8x128xf32, #tpu.memory_space<vmem>>, vector<8x128xf32>,
    return
  }
  func.func @transform_0(%arg0: i32) -> (i32, i32) {
    %c0_i32 = arith.constant 0 : i32
    %c0_i32_0 = arith.constant 0 : i32
    %c0_i32_1 = arith.constant 0 : i32
    return %c0_i32, %c0_i32_0 : i32, i32
  }
  func.func @transform_1(%arg0: i32) -> (i32, i32) {
    %c0_i32 = arith.constant 0 : i32
    %c0_i32_0 = arith.constant 0 : i32
    %c0_i32_1 = arith.constant 0 : i32
    return %c0_i32, %c0_i32_0 : i32, i32
  }
  func.func @transform_2(%arg0: i32) -> (i32, i32) {
    %c0_i32 = arith.constant 0 : i32
    %c0_i32_0 = arith.constant 0 : i32
    %c0_i32_1 = arith.constant 0 : i32
    return %c0_i32, %c0_i32_0 : i32, i32
  }
  func.func @transform_3(%arg0: i32) -> (i32, i32) {
    %c0_i32 = arith.constant 0 : i32
    %c0_i32_0 = arith.constant 0 : i32
    %c0_i32_1 = arith.constant 0 : i32
    return %c0_i32, %c0_i32_0 : i32, i32
  }
  func.func @transform_4(%arg0: i32) -> (i32, i32) {
    %c0_i32 = arith.constant 0 : i32
    %c0_i32_0 = arith.constant 0 : i32
    %c0_i32_1 = arith.constant 0 : i32
    return %c0_i32, %c0_i32_0 : i32, i32
  }
  func.func @transform_5(%arg0: i32) -> (i32, i32) {
    %c0_i32 = arith.constant 0 : i32
    %c0_i32_0 = arith.constant 0 : i32
    %c0_i32_1 = arith.constant 0 : i32
    return %c0_i32, %c0_i32_0 : i32, i32
  }
  func.func @transform_6(%arg0: i32) -> (i32, i32) {
    %c0_i32 = arith.constant 0 : i32
    %c0_i32_0 = arith.constant 0 : i32
    %c0_i32_1 = arith.constant 0 : i32
    return %c0_i32, %c0_i32_0 : i32, i32
  }
  func.func @transform_7(%arg0: i32) -> (i32, i32) {
    %c0_i32 = arith.constant 0 : i32
    %c0_i32_0 = arith.constant 0 : i32
    %c0_i32_1 = arith.constant 0 : i32
    return %c0_i32, %c0_i32_0 : i32, i32
  }
}

</mosaic_0001>

<bundles_post_ra>
// kernel: tpu_custom_call.1
= control target key start
LH: loop header
LB: loop body
LE: loop exit
PB: predicated region body
PF: predicated region fallthrough
CT: control target
= control target key end

     0   :  { %12 = vsyncpa [#allocation3], 0  ;;  %s1012_s0 = inlined_call_operand.hbm [shape: f32[8,16], index: 0, kind: input, shape index: {}]   ;;  %s1013_s1 = inlined_call_operand.hbm [shape: f32[16,128], index: 1, kind: input, shape index: {}]   ;;  %s1014_s2 = inlined_call_operand.hbm [shape: f32[2,128], index: 2, kind: input, shape index: {}]   ;;  %s1015_s3 = inlined_call_operand.hbm [shape: f32[128,128], index: 3, kind: input, shape index: {}]   ;;  %s1016_s4 = inlined_call_operand.hbm [shape: f32[2,128], index: 4, kind: input, shape index: {}]   ;;  %s1017_s5 = inlined_call_operand.hbm [shape: f32[128,128], index: 5, kind: input, shape index: {}]   ;;  %s1018_s6 = inlined_call_operand.hbm [shape: f32[1,128], index: 6, kind: input, shape index: {}]   ;;  %s1019_s7 = inlined_call_operand.hbm [shape: f32[8,128], index: 7, kind: output, shape index: {}]  }
   0x1   :  { %13 = vsyncpa [#allocation6], 0 }
   0x2   :  { %14 = vsyncpa [#allocation9], 0 }
   0x3   :  { %15 = vsyncpa [#allocation12], 0 }
   0x4   :  { %16 = vsyncpa [#allocation4], 0  ;;  %s831_s24 = smov [#allocation5]   ;;  %s645_s28 = scalar_lea.hbm %s1013_s1, 256 }
   0x5   :  { %s32_s25 = sshll.u32 %s831_s24, 4  ;;  %p646_p0 = scmp.ne.s32.totalorder %s1013_s1, %s645_s28  ;;  %s33_s25 = int_to_ptr.vmem [resolvable:$true] %s32_s25 }
   0x6   :  { %p649_p1 = scmp.lt.u32.totalorder %s645_s28, %s1013_s1 }
   0x8   :  { %p651_p2 = pnand %p649_p1, %p646_p0 }
   0xa   :  { %654 = shalt.err (!%p651_p2)
}
   0xb   :  { %s655_s10 = scalar_lea.vmem %s33_s25, 256  ;;  %p660_p4 = scmp.lt.s32.totalorder %s33_s25, %s33_s25 }
   0xc   :  { %p656_p3 = scmp.ne.s32.totalorder %s33_s25, %s655_s10  ;;  %p661_p5 = scmp.lt.s32.totalorder %s655_s10, %s655_s10 }
   0xe   :  { %p662_p6 = por %p661_p5, %p660_p4 }
  0x10   :  { %p663_p7 = pnand %p662_p6, %p656_p3 }
  0x12   :  { %666 = shalt.err (!%p663_p7)
}
  0x13   :  { %s832_s11 = smov 128   ;;  %s833_s12 = smov 8  }
  0x14   :  { %38 = dma.hbm_to_vmem [thread:$0]  %s1013_s1, 256, %s33_s25, [#allocation6], %s832_s11, %s832_s11, %s833_s12  }
  0x15   :  { %s834_s15 = smov [#allocation8]   ;;  %s835_s17 = smov [#allocation11]  }
  0x16   :  { %s54_s16 = sshll.u32 %s834_s15, 4  ;;  %s76_s18 = sshll.u32 %s835_s17, 4  ;;  %s55_s16 = int_to_ptr.vmem [resolvable:$true] %s54_s16  ;;  %s77_s18 = int_to_ptr.vmem [resolvable:$true] %s76_s18 }
  0x17   :  { %s667_s21 = scalar_lea.hbm %s1015_s3, 2048 }
  0x18   :  { %p668_p8 = scmp.ne.s32.totalorder %s1015_s3, %s667_s21  ;;  %p671_p9 = scmp.lt.u32.totalorder %s667_s21, %s1015_s3 }
  0x1a   :  { %p673_p10 = pnand %p671_p9, %p668_p8 }
  0x1c   :  { %676 = shalt.err (!%p673_p10)
}
  0x1d   :  { %s677_s1 = scalar_lea.vmem %s55_s16, 2048  ;;  %p682_p12 = scmp.lt.s32.totalorder %s55_s16, %s55_s16 }
  0x1e   :  { %p678_p11 = scmp.ne.s32.totalorder %s55_s16, %s677_s1  ;;  %p683_p13 = scmp.lt.s32.totalorder %s677_s1, %s677_s1 }
  0x20   :  { %p684_p0 = por %p683_p13, %p682_p12 }
  0x22   :  { %p685_p1 = pnand %p684_p0, %p678_p11 }
  0x24   :  { %688 = shalt.err (!%p685_p1)
}
  0x25   :  { %60 = dma.hbm_to_vmem [thread:$0]  %s1015_s3, 2048, %s55_s16, [#allocation9], %s832_s11, %s832_s11, %s833_s12  }
  0x26   :  { %s689_s30 = scalar_lea.hbm %s1017_s5, 2048 }
  0x27   :  { %p690_p2 = scmp.ne.s32.totalorder %s1017_s5, %s689_s30  ;;  %p693_p3 = scmp.lt.u32.totalorder %s689_s30, %s1017_s5 }
  0x29   :  { %p695_p4 = pnand %p693_p3, %p690_p2 }
  0x2b   :  { %698 = shalt.err (!%p695_p4)
}
  0x2c   :  { %s699_s14 = scalar_lea.vmem %s77_s18, 2048  ;;  %p704_p6 = scmp.lt.s32.totalorder %s77_s18, %s77_s18 }
  0x2d   :  { %p700_p5 = scmp.ne.s32.totalorder %s77_s18, %s699_s14  ;;  %p705_p7 = scmp.lt.s32.totalorder %s699_s14, %s699_s14 }
  0x2f   :  { %p706_p8 = por %p705_p7, %p704_p6 }
  0x31   :  { %p707_p9 = pnand %p706_p8, %p700_p5 }
  0x33   :  { %710 = shalt.err (!%p707_p9)
}
  0x34   :  { %82 = dma.hbm_to_vmem [thread:$0]  %s1017_s5, 2048, %s77_s18, [#allocation12], %s832_s11, %s832_s11, %s833_s12  }
  0x35   :  { %s836_s16 = smov [#allocation2]   ;;  %s837_s19 = smov [#allocation7]  }
  0x36   :  { %s23_s17 = sshll.u32 %s836_s16, 4  ;;  %s45_s20 = sshll.u32 %s837_s19, 4  ;;  %s24_s17 = int_to_ptr.vmem [resolvable:$true] %s23_s17  ;;  %s46_s20 = int_to_ptr.vmem [resolvable:$true] %s45_s20 }
  0x37   :  { %s711_s23 = scalar_lea.hbm %s1012_s0, 128 }
  0x38   :  { %p712_p10 = scmp.ne.s32.totalorder %s1012_s0, %s711_s23  ;;  %p715_p11 = scmp.lt.u32.totalorder %s711_s23, %s1012_s0 }
  0x3a   :  { %p717_p12 = pnand %p715_p11, %p712_p10 }
  0x3c   :  { %720 = shalt.err (!%p717_p12)
}
  0x3d   :  { %s721_s5 = scalar_lea.vmem %s24_s17, 128  ;;  %p726_p0 = scmp.lt.s32.totalorder %s24_s17, %s24_s17 }
  0x3e   :  { %p722_p13 = scmp.ne.s32.totalorder %s24_s17, %s721_s5  ;;  %p727_p1 = scmp.lt.s32.totalorder %s721_s5, %s721_s5 }
  0x40   :  { %p728_p2 = por %p727_p1, %p726_p0 }
  0x42   :  { %p729_p3 = pnand %p728_p2, %p722_p13 }
  0x44   :  { %732 = shalt.err (!%p729_p3)
}
  0x45   :  { %26 = dma.hbm_to_vmem [thread:$0]  %s1012_s0, 128, %s24_s17, [#allocation3]  }
  0x46   :  { %s733_s28 = scalar_lea.hbm %s1014_s2, 32 }
  0x47   :  { %p734_p4 = scmp.ne.s32.totalorder %s1014_s2, %s733_s28  ;;  %p737_p5 = scmp.lt.u32.totalorder %s733_s28, %s1014_s2 }
  0x49   :  { %p739_p6 = pnand %p737_p5, %p734_p4 }
  0x4b   :  { %742 = shalt.err (!%p739_p6)
}
  0x4c   :  { %s743_s10 = scalar_lea.vmem %s46_s20, 32  ;;  %p748_p8 = scmp.lt.s32.totalorder %s46_s20, %s46_s20 }
  0x4d   :  { %p744_p7 = scmp.ne.s32.totalorder %s46_s20, %s743_s10  ;;  %p749_p9 = scmp.lt.s32.totalorder %s743_s10, %s743_s10 }
  0x4f   :  { %p750_p10 = por %p749_p9, %p748_p8 }
  0x51   :  { %p751_p11 = pnand %p750_p10, %p744_p7 }
  0x53   :  { %754 = shalt.err (!%p751_p11)
}
  0x54   :  { %48 = dma.hbm_to_vmem [thread:$0]  %s1014_s2, 32, %s46_s20, [#allocation6]  }
  0x55   :  { %s838_s14 = smov [#allocation10]   ;;  %s839_s15 = smov [#allocation13]  }
  0x56   :  { %s67_s3 = sshll.u32 %s838_s14, 4  ;;  %s89_s16 = sshll.u32 %s839_s15, 4  ;;  %s68_s3 = int_to_ptr.vmem [resolvable:$true] %s67_s3  ;;  %s90_s16 = int_to_ptr.vmem [resolvable:$true] %s89_s16 }
  0x57   :  { %s755_s21 = scalar_lea.hbm %s1016_s4, 32 }
  0x58   :  { %p756_p12 = scmp.ne.s32.totalorder %s1016_s4, %s755_s21  ;;  %p759_p13 = scmp.lt.u32.totalorder %s755_s21, %s1016_s4 }
  0x5a   :  { %p761_p0 = pnand %p759_p13, %p756_p12 }
  0x5c   :  { %764 = shalt.err (!%p761_p0)
}
  0x5d   :  { %s765_s2 = scalar_lea.vmem %s68_s3, 32  ;;  %p770_p2 = scmp.lt.s32.totalorder %s68_s3, %s68_s3 }
  0x5e   :  { %p766_p1 = scmp.ne.s32.totalorder %s68_s3, %s765_s2  ;;  %p771_p3 = scmp.lt.s32.totalorder %s765_s2, %s765_s2 }
  0x60   :  { %p772_p4 = por %p771_p3, %p770_p2 }
  0x62   :  { %p773_p5 = pnand %p772_p4, %p766_p1 }
  0x64   :  { %776 = shalt.err (!%p773_p5)
}
  0x65   :  { %70 = dma.hbm_to_vmem [thread:$0]  %s1016_s4, 32, %s68_s3, [#allocation9]  }
  0x66   :  { %s777_s11 = scalar_lea.hbm %s1018_s6, 16 }
  0x67   :  { %p778_p6 = scmp.ne.s32.totalorder %s1018_s6, %s777_s11  ;;  %p781_p7 = scmp.lt.u32.totalorder %s777_s11, %s1018_s6 }
  0x69   :  { %p783_p8 = pnand %p781_p7, %p778_p6 }
  0x6b   :  { %786 = shalt.err (!%p783_p8)
}
  0x6c   :  { %s787_s29 = scalar_lea.vmem %s90_s16, 16  ;;  %s791_s30 = scalar_lea.vmem %s90_s16, 32 }
  0x6d   :  { %p788_p9 = scmp.ne.s32.totalorder %s90_s16, %s787_s29  ;;  %p792_p10 = scmp.lt.s32.totalorder %s90_s16, %s90_s16 }
  0x6e   :  { %p793_p11 = scmp.lt.s32.totalorder %s791_s30, %s787_s29 }
  0x70   :  { %p794_p12 = por %p793_p11, %p792_p10 }
  0x72   :  { %p795_p13 = pnand %p794_p12, %p788_p9 }
  0x74   :  { %798 = shalt.err (!%p795_p13)
}
  0x75   :  { %92 = dma.hbm_to_vmem [thread:$0]  %s1018_s6, 16, %s90_s16, [#allocation12]  }
  0x76   :  { %821 = dma.done.wait [#allocation3], 128  }
  0x77   :  { %822 = vsyncadd [#allocation3], 4294967168 }
  0x78   :  { %823 = dma.done.wait [#allocation6], 288  }
  0x79   :  { %824 = vsyncadd [#allocation6], 4294967008 }
  0x7a   :  { %825 = dma.done.wait [#allocation9], 2080  }
  0x7b   :  { %826 = vsyncadd [#allocation9], 4294965216 }
  0x7c   :  { %827 = dma.done.wait [#allocation12], 2064  }
  0x7d   :  { %828 = vsyncadd [#allocation12], 4294965232  ;;  %v840_v0 = vmov 0.0|0.0   ;;  %vm841_vm0 = vmmov 0   ;;  %v842_v1 = vmov 0.0   ;;  %v115_v2 = vld [vmem:[#allocation5] sm:$0xff]  ;;  %v216_v51 = vlaneseq }
  0x7e   :  { %577 = vmatprep.subr.bf16.mxu0 %v840_v0  ;;  %504 = vmatprep.mubr.msk.f32.mxu0 %vm841_vm0, %v842_v1  ;;  %v116_v3 = vld [vmem:[#allocation5 + $0x8] sm:$0xff]  ;;  %v114_v5 = vld [vmem:[#allocation2] sm:$0xff]  ;;  %vm117_vm1 = vcmask 130048   ;;  %v209_v53 = vld [vmem:[#allocation7] sm:$0x1]  ;;  %s843_s6 = smov [#allocation14]  }
  0x7f   :  { %580 = vmatprep.subr.bf16.mxu1 %v840_v0  ;;  %539 = vmatprep.mubr.msk.f32.mxu1 %vm841_vm0, %v842_v1  ;;  %v578_v4 = vpack.c.bf16 %v116_v3, %v115_v2  ;;  %v227_v6 = vld [vmem:[#allocation8] sm:$0xff]  ;;  %v228_v7 = vld [vmem:[#allocation8 + $0x8] sm:$0xff]  ;;  %v229_v9 = vld [vmem:[#allocation8 + $0x10] sm:$0xff]  ;;  %v217_v52 = vshrl.u32 %v216_v51, 7  ;;  %s449_s9 = sshll.u32 %s843_s6, 4  ;;  %s450_s9 = int_to_ptr.vmem [resolvable:$true] %s449_s9 }
  0x80   :  { %v581_v8 = vpack.c.bf16 %v228_v7, %v227_v6  ;;  %v230_v10 = vld [vmem:[#allocation8 + $0x18] sm:$0xff]  ;;  %v231_v12 = vld [vmem:[#allocation8 + $0x20] sm:$0xff]  ;;  %v232_v13 = vld [vmem:[#allocation8 + $0x28] sm:$0xff]  ;;  %s799_s10 = scalar_lea.vmem %s450_s9, 128  ;;  %p804_p1 = scmp.lt.s32.totalorder %s450_s9, %s450_s9 }
  0x81   :  { %579 = vmatpush3.bf16.msra.mxu0 %v578_v4  ;;  %v584_v11 = vpack.c.bf16 %v230_v10, %v229_v9  ;;  %v587_v14 = vpack.c.bf16 %v232_v13, %v231_v12  ;;  %v233_v15 = vld [vmem:[#allocation8 + $0x30] sm:$0xff]  ;;  %v234_v16 = vld [vmem:[#allocation8 + $0x38] sm:$0xff]  ;;  %v235_v18 = vld [vmem:[#allocation8 + $0x40] sm:$0xff]  ;;  %v987_v54 = vsub.s32 0, %v217_v52  ;;  %p800_p0 = scmp.ne.s32.totalorder %s450_s9, %s799_s10  ;;  %p805_p2 = scmp.lt.s32.totalorder %s799_s10, %s799_s10 }
  0x82   :  { %604 = vmatprep.subr.bf16.mxu0 %v840_v0  ;;  %582 = vmatpush3.bf16.msra.mxu1 %v581_v8  ;;  %v590_v17 = vpack.c.bf16 %v234_v16, %v233_v15  ;;  %v236_v19 = vld [vmem:[#allocation8 + $0x48] sm:$0xff]  ;;  %v237_v21 = vld [vmem:[#allocation8 + $0x50] sm:$0xff]  ;;  %v238_v22 = vld [vmem:[#allocation8 + $0x58] sm:$0xff] }
  0x83   :  { %583 = vmatprep.subr.bf16.mxu1 %v840_v0  ;;  %v593_v20 = vpack.c.bf16 %v236_v19, %v235_v18  ;;  %v596_v23 = vpack.c.bf16 %v238_v22, %v237_v21  ;;  %v239_v24 = vld [vmem:[#allocation8 + $0x60] sm:$0xff]  ;;  %v240_v25 = vld [vmem:[#allocation8 + $0x68] sm:$0xff]  ;;  %v241_v27 = vld [vmem:[#allocation8 + $0x70] sm:$0xff]  ;;  %p806_p3 = por %p805_p2, %p804_p1 }
  0x84   :  { %505 = vmatmul.mubr.msk.f32.vlgmr.msra.gmra.mrb[0].mxu0 %vm117_vm1, %v114_v5  ;;  %v599_v26 = vpack.c.bf16 %v240_v25, %v239_v24  ;;  %v242_v28 = vld [vmem:[#allocation8 + $0x78] sm:$0xff]  ;;  %v349_v2 = vld [vmem:[#allocation11] sm:$0xff]  ;;  %v350_v3 = vld [vmem:[#allocation11 + $0x8] sm:$0xff] }
  0x85   :  { %574 = vmatprep.mubr.msk.f32.mxu0 %vm841_vm0, %v842_v1  ;;  %v602_v29 = vpack.c.bf16 %v242_v28, %v241_v27  ;;  %v213_v57 = vld [vmem:[#allocation7 + $0x1] sm:$0x1]  ;;  %v605_v4 = vpack.c.bf16 %v350_v3, %v349_v2  ;;  %v351_v5 = vld [vmem:[#allocation11 + $0x10] sm:$0xff]  ;;  %v353_v8 = vld [vmem:[#allocation11 + $0x20] sm:$0xff]  ;;  %p807_p4 = pnand %p806_p3, %p800_p0 }
  0x86   :  { %585 = vmatpush3.bf16.msra.mxu1 %v584_v11  ;;  %v352_v6 = vld [vmem:[#allocation11 + $0x18] sm:$0xff]  ;;  %v354_v9 = vld [vmem:[#allocation11 + $0x28] sm:$0xff]  ;;  %v355_v11 = vld [vmem:[#allocation11 + $0x30] sm:$0xff] }
  0x87   :  { %586 = vmatprep.subr.bf16.mxu1 %v840_v0  ;;  %606 = vmatpush3.bf16.msra.mxu0 %v605_v4  ;;  %v608_v7 = vpack.c.bf16 %v352_v6, %v351_v5  ;;  %v611_v10 = vpack.c.bf16 %v354_v9, %v353_v8  ;;  %v356_v12 = vld [vmem:[#allocation11 + $0x38] sm:$0xff]  ;;  %v358_v15 = vld [vmem:[#allocation11 + $0x48] sm:$0xff] }
  0x88   :  { %607 = vmatprep.subr.bf16.mxu0 %v840_v0  ;;  %v614_v13 = vpack.c.bf16 %v356_v12, %v355_v11  ;;  %v360_v18 = vld [vmem:[#allocation11 + $0x58] sm:$0xff]  ;;  %v362_v21 = vld [vmem:[#allocation11 + $0x68] sm:$0xff] }
  0x89   :  { %v364_v24 = vld [vmem:[#allocation11 + $0x78] sm:$0xff] }
  0x8a   :  { %588 = vmatpush3.bf16.msra.mxu1 %v587_v14  ;;  %v357_v14 = vld [vmem:[#allocation11 + $0x40] sm:$0xff] }
  0x8b   :  { %589 = vmatprep.subr.bf16.mxu1 %v840_v0  ;;  %609 = vmatpush3.bf16.msra.mxu0 %v608_v7  ;;  %v617_v16 = vpack.c.bf16 %v358_v15, %v357_v14 }
  0x8c   :  { %610 = vmatprep.subr.bf16.mxu0 %v840_v0 }
  0x8e   :  { %591 = vmatpush3.bf16.msra.mxu1 %v590_v17  ;;  %v359_v17 = vld [vmem:[#allocation11 + $0x50] sm:$0xff] }
  0x8f   :  { %592 = vmatprep.subr.bf16.mxu1 %v840_v0  ;;  %612 = vmatpush3.bf16.msra.mxu0 %v611_v10  ;;  %v620_v19 = vpack.c.bf16 %v360_v18, %v359_v17 }
  0x90   :  { %613 = vmatprep.subr.bf16.mxu0 %v840_v0 }
  0x92   :  { %594 = vmatpush3.bf16.msra.mxu1 %v593_v20  ;;  %v361_v20 = vld [vmem:[#allocation11 + $0x60] sm:$0xff] }
  0x93   :  { %595 = vmatprep.subr.bf16.mxu1 %v840_v0  ;;  %615 = vmatpush3.bf16.msra.mxu0 %v614_v13  ;;  %v623_v22 = vpack.c.bf16 %v362_v21, %v361_v20 }
  0x94   :  { %616 = vmatprep.subr.bf16.mxu0 %v840_v0 }
  0x96   :  { %597 = vmatpush3.bf16.msra.mxu1 %v596_v23  ;;  %v363_v23 = vld [vmem:[#allocation11 + $0x70] sm:$0xff] }
  0x97   :  { %598 = vmatprep.subr.bf16.mxu1 %v840_v0  ;;  %618 = vmatpush3.bf16.msra.mxu0 %v617_v16  ;;  %v626_v25 = vpack.c.bf16 %v364_v24, %v363_v23 }
  0x98   :  { %619 = vmatprep.subr.bf16.mxu0 %v840_v0 }
  0x9a   :  { %600 = vmatpush3.bf16.msra.mxu1 %v599_v26 }
  0x9b   :  { %601 = vmatprep.subr.bf16.mxu1 %v840_v0  ;;  %621 = vmatpush3.bf16.msra.mxu0 %v620_v19 }
  0x9c   :  { %622 = vmatprep.subr.bf16.mxu0 %v840_v0 }
  0x9e   :  { %603 = vmatpush3.bf16.msra.mxu1 %v602_v29 }
  0x9f   :  { %624 = vmatpush3.bf16.msra.mxu0 %v623_v22 }
  0xa0   :  { %625 = vmatprep.subr.bf16.mxu0 %v840_v0 }
  0xa3   :  { %627 = vmatpush3.bf16.msra.mxu0 %v626_v25 }
 0x157   :  { %v187_v30 = vpop.f32.mrb[0].mxu0 }
 0x158   :  { %v191_v31 = vrot.slane %v187_v30, 4  ;;  %v198_v32 = vmul.f32 %v187_v30, %v187_v30  ;;  %v506_v33 = vpop.f32.mrb[1].mxu0 }
 0x15a   :  { %v192_v34 = vadd.f32 %v191_v31, %v187_v30  ;;  %v199_v35 = vrot.slane %v198_v32, 4 }
 0x15c   :  { %v193_v36 = vrot.slane %v192_v34, 2  ;;  %v200_v37 = vadd.f32 %v199_v35, %v198_v32 }
 0x15e   :  { %v194_v38 = vadd.f32 %v193_v36, %v192_v34  ;;  %v201_v39 = vrot.slane %v200_v37, 2 }
 0x160   :  { %v195_v40 = vrot.slane %v194_v38, 1  ;;  %v202_v41 = vadd.f32 %v201_v39, %v200_v37 }
 0x162   :  { %v196_v42 = vadd.f32 %v195_v40, %v194_v38  ;;  %v203_v43 = vrot.slane %v202_v41, 1 }
 0x164   :  { %v197_v44 = vmul.f32 0.125, %v196_v42  ;;  %v204_v45 = vadd.f32 %v203_v43, %v202_v41 }
 0x166   :  { %v205_v46 = vmul.f32 0.125, %v204_v45  ;;  %v206_v47 = vmul.f32 %v197_v44, %v197_v44 }
 0x168   :  { %v207_v48 = vsub.f32 %v205_v46, %v206_v47  ;;  %v331_v46 = vld [vmem:[#allocation10] sm:$0x1] }
 0x16a   :  { %v208_v49 = vmax.f32 %v207_v48, 0.0 }
 0x16c   :  { %v210_v50 = vadd.f32 1e-05, %v208_v49  ;;  %v335_v49 = vld [vmem:[#allocation10 + $0x1] sm:$0x1] }
 0x16e   :  { %641 = vrsqrt.f32 %v210_v50 }
 0x178   :  { %v642_v55 = vpop.eup %641 }
 0x179   :  { %v212_v56 = vmul.f32 %v642_v55, %v209_v53 }
 0x17b   :  { %v219_v58 = vrot.slane %v212_v56, %v987_v54  ;;  %v214_v59 = vmul.f32 %v212_v56, %v197_v44 }
 0x17d   :  { %v215_v60 = vsub.f32 %v213_v57, %v214_v59  ;;  %v220_v61 = vmul.f32 %v219_v58, %v187_v30  ;;  %v462_v58 = vld [vmem:[#allocation13] ss:$0 sm:$0xff] }
 0x17f   :  { %v224_v62 = vrot.slane %v215_v60, %v987_v54 }
 0x181   :  { %v225_v63 = vadd.f32 %v224_v62, %v220_v61 }
 0x183   :  { %v226_v1 = vmax.f32 %v225_v63, 0.0 }
 0x185   :  { %540 = vmatmul.mubr.f32.vlgmr.msra.gmra.mrb[0].mxu1 %v226_v1 }
 0x258   :  { %v309_v26 = vpop.f32.mrb[0].mxu1 }
 0x259   :  { %v313_v27 = vrot.slane %v309_v26, 4  ;;  %v320_v28 = vmul.f32 %v309_v26, %v309_v26  ;;  %v541_v29 = vpop.f32.mrb[1].mxu1 }
 0x25b   :  { %v314_v30 = vadd.f32 %v313_v27, %v309_v26  ;;  %v321_v31 = vrot.slane %v320_v28, 4 }
 0x25d   :  { %v315_v32 = vrot.slane %v314_v30, 2  ;;  %v322_v33 = vadd.f32 %v321_v31, %v320_v28 }
 0x25f   :  { %v316_v34 = vadd.f32 %v315_v32, %v314_v30  ;;  %v323_v35 = vrot.slane %v322_v33, 2 }
 0x261   :  { %v317_v36 = vrot.slane %v316_v34, 1  ;;  %v324_v37 = vadd.f32 %v323_v35, %v322_v33 }
 0x263   :  { %v318_v38 = vadd.f32 %v317_v36, %v316_v34  ;;  %v325_v39 = vrot.slane %v324_v37, 1 }
 0x265   :  { %v319_v40 = vmul.f32 0.125, %v318_v38  ;;  %v326_v0 = vadd.f32 %v325_v39, %v324_v37 }
 0x267   :  { %v327_v41 = vmul.f32 0.125, %v326_v0  ;;  %v328_v42 = vmul.f32 %v319_v40, %v319_v40 }
 0x269   :  { %v329_v43 = vsub.f32 %v327_v41, %v328_v42 }
 0x26b   :  { %v330_v44 = vmax.f32 %v329_v43, 0.0 }
 0x26d   :  { %v332_v45 = vadd.f32 1e-05, %v330_v44 }
 0x26f   :  { %643 = vrsqrt.f32 %v332_v45 }
 0x279   :  { %v644_v47 = vpop.eup %643 }
 0x27a   :  { %v334_v48 = vmul.f32 %v644_v47, %v331_v46 }
 0x27c   :  { %v336_v50 = vmul.f32 %v334_v48, %v319_v40  ;;  %v341_v51 = vrot.slane %v334_v48, %v987_v54 }
 0x27e   :  { %v337_v52 = vsub.f32 %v335_v49, %v336_v50  ;;  %v342_v53 = vmul.f32 %v341_v51, %v309_v26 }
 0x280   :  { %v346_v55 = vrot.slane %v337_v52, %v987_v54 }
 0x282   :  { %v347_v56 = vadd.f32 %v346_v55, %v342_v53 }
 0x284   :  { %v348_v57 = vmax.f32 %v347_v56, 0.0 }
 0x286   :  { %575 = vmatmul.mubr.f32.vlgmr.msra.gmra.mrb[2].mxu0 %v348_v57 }
 0x359   :  { %v438_v59 = vpop.f32.mrb[2].mxu0 }
 0x35a   :  { %v439_v60 = vadd.f32 %v462_v58, %v438_v59  ;;  %v576_v61 = vpop.f32.mrb[3].mxu0 }
 0x35c   :  { %442 = vst [vmem:[#allocation14] sm:$0xff] %v439_v60 }
 0x35d   :  { %810 = shalt.err (!%p807_p4)
}
 0x35e   :  { %s811_s14 = scalar_lea.hbm %s1019_s7, 128 }
 0x35f   :  { %p812_p5 = scmp.ne.s32.totalorder %s1019_s7, %s811_s14  ;;  %p815_p6 = scmp.lt.u32.totalorder %s811_s14, %s1019_s7 }
 0x361   :  { %p817_p7 = pnand %p815_p6, %p812_p5 }
 0x363   :  { %820 = shalt.err (!%p817_p7)
}
 0x364   :  { %452 = dma.vmem_to_hbm [thread:$0]  %s450_s9, 128, %s1019_s7, [#allocation4]  }
 0x365   :  { %829 = dma.done.wait [#allocation4], 128  }
 0x366   :  { %830 = vsyncadd [#allocation4], 4294967168 }
 0x367   :  { %456 = vsyncpa [#allocation3], 1 }
 0x368   :  { %457 = vsyncpa [#allocation6], 1 }
 0x369   :  { %458 = vsyncpa [#allocation9], 1 }
 0x36a   :  { %459 = vsyncpa [#allocation12], 1 }
 0x36b   :  { %460 = vsyncpa [#allocation4], 1 }

</bundles_post_ra>
